<compile_context>
chip_gen: v5e
topology: v5e:2x2
jax: 0.10.0
libtpu: 0.0.40
codegen_flags: <defaults>
</compile_context>

<pallas_src>
import jax
import jax.numpy as jnp
from jax.experimental import pallas as pl
from jax.experimental.pallas import tpu as pltpu


def _make_kernel(total_rows, tb, tiles_per_split, needs_mask):
    """total_rows/tb/tiles_per_split are static Python ints baked into the kernel."""

    def kernel(x_ref, y_ref, o_ref, acc_ref):
        s = pl.program_id(0)          # split (parallel) index
        i = pl.program_id(1)          # tile (reduction) index within split

        @pl.when(i == 0)
        def _():
            acc_ref[...] = jnp.zeros_like(acc_ref)

        # Upcast per tile inside the kernel; inputs stay narrow on the HBM wire.
        x = x_ref[...].astype(jnp.float32)            # (TB, D)
        y = y_ref[...].astype(jnp.float32)

        eps = jnp.float32(1e-12)                      # F.normalize default eps

        # Fused normalization: three per-row reductions instead of normalizing
        # full (TB, D) tiles.
        xx = jnp.sum(x * x, axis=-1, keepdims=True)   # (TB, 1)
        yy = jnp.sum(y * y, axis=-1, keepdims=True)   # (TB, 1)
        xy = jnp.sum(x * y, axis=-1, keepdims=True)   # (TB, 1)

        # Clamp each norm separately (exact F.normalize eps semantics).
        nx = jnp.maximum(jnp.sqrt(xx), eps)
        ny = jnp.maximum(jnp.sqrt(yy), eps)

        # Single per-row reciprocal on the (otherwise idle) EUP slot.
        cos = xy * pl.reciprocal(nx * ny, approx=True)          # (TB, 1)
        per_row = jnp.float32(2.0) - jnp.float32(2.0) * cos     # (TB, 1)

        if needs_mask:
            # Zero out padded rows in the (possibly partial) last tiles.
            base = (s * tiles_per_split + i) * tb
            row_idx = base + jax.lax.broadcasted_iota(jnp.int32, per_row.shape, 0)
            per_row = jnp.where(row_idx < total_rows, per_row, jnp.float32(0.0))

        acc_ref[...] += jnp.sum(per_row, keepdims=True)          # (1, 1)

        # Store the per-split partial sum exactly once.
        @pl.when(i == tiles_per_split - 1)
        def _():
            o_ref[...] = acc_ref[...]

    return kernel


def representation_loss(x, y):
    """x, y: arrays of identical shape (..., D). Returns scalar float32 loss."""
    assert x.shape == y.shape
    d = x.shape[-1]
    x2 = x.reshape(-1, d)
    y2 = y.reshape(-1, d)
    n_rows = x2.shape[0]

    # --- tile sizing: 2 inputs x 2 pipeline buffers x TB x D x bytes <= ~8 MiB,
    #     which stays inside the scoped-VMEM default on v5e (16 MiB), v6e (32 MiB)
    #     and the smaller physical VMEM of v7x (64 MiB).
    bytes_per_el = x2.dtype.itemsize
    budget_bytes = 8 * 1024 * 1024
    tb = budget_bytes // (4 * d * bytes_per_el)
    tb = max(8, min(1024, (tb // 8) * 8))
    rows_rounded = ((n_rows + 7) // 8) * 8
    tb = min(tb, rows_rounded)                     # still a multiple of 8

    num_tiles = (n_rows + tb - 1) // tb
    # 2-way outer split exploits both TensorCores on v7x; it just serializes
    # (with negligible overhead) on single-core v5e/v6e.
    num_splits = 2 if num_tiles >= 2 else 1
    tiles_per_split = (num_tiles + num_splits - 1) // num_splits
    padded_rows = num_splits * tiles_per_split * tb

    needs_mask = padded_rows != n_rows
    if needs_mask:
        pad = padded_rows - n_rows
        x2 = jnp.pad(x2, ((0, pad), (0, 0)))
        y2 = jnp.pad(y2, ((0, pad), (0, 0)))

    kernel = _make_kernel(n_rows, tb, tiles_per_split, needs_mask)

    def in_map(s, i):
        return (s * tiles_per_split + i, 0)

    partials = pl.pallas_call(
        kernel,
        out_shape=jax.ShapeDtypeStruct((num_splits, 1), jnp.float32),
        grid_spec=pltpu.PrefetchScalarGridSpec(
            num_scalar_prefetch=0,
            grid=(num_splits, tiles_per_split),
            in_specs=[
                pl.BlockSpec((tb, d), in_map),
                pl.BlockSpec((tb, d), in_map),
            ],
            out_specs=pl.BlockSpec((1, 1), lambda s, i: (s, 0)),
            scratch_shapes=[pltpu.VMEM((1, 1), jnp.float32)],
        ),
        compiler_params=pltpu.CompilerParams(
            dimension_semantics=("parallel", "arbitrary")),
    )(x2, y2)

    return jnp.sum(partials) / jnp.float32(n_rows)


def _reference(x, y):
    # Pure-JAX reference mirroring the PyTorch code.
    def norm(v):
        n = jnp.sqrt(jnp.sum(v * v, axis=-1, keepdims=True))
        return v / jnp.maximum(n, 1e-12)

    xn = norm(x.astype(jnp.float32))
    yn = norm(y.astype(jnp.float32))
    return jnp.mean(2.0 - 2.0 * jnp.sum(xn * yn, axis=-1))


if __name__ == "__main__":
    key = jax.random.PRNGKey(0)

    # Case 1: small representation batch (batch=2, seq=8, hidden=32), f32.
    k1, k2, k3, k4 = jax.random.split(key, 4)
    x1 = jax.random.normal(k1, (2, 8, 32), dtype=jnp.float32)
    y1 = jax.random.normal(k2, (2, 8, 32), dtype=jnp.float32)
    loss1 = representation_loss(x1, y1)
    jax.block_until_ready(loss1)
    ref1 = _reference(x1, y1)
    # Tolerance accounts for the approximate per-row reciprocal (EUP) vs exact divide.
    assert jnp.allclose(loss1, ref1, atol=2e-3, rtol=2e-3), (loss1, ref1)

    # Case 2: exercises multi-tile grid, 2-way split, padding mask, bf16 streaming.
    x2 = jax.random.normal(k3, (2304, 64), dtype=jnp.float32).astype(jnp.bfloat16)
    y2 = jax.random.normal(k4, (2304, 64), dtype=jnp.float32).astype(jnp.bfloat16)
    loss2 = representation_loss(x2, y2)
    jax.block_until_ready(loss2)
    ref2 = _reference(x2, y2)
    assert jnp.allclose(loss2, ref2, atol=2e-3, rtol=2e-3), (loss2, ref2)

    print("KERNEL_OK")
</pallas_src>

<mosaic_0001>
module attributes {stable_mosaic.version = 11 : i64} {
  func.func @kernel(%arg0: i32, %arg1: i32, %arg2: memref<16x32xf32, #tpu.memory_space<vmem>>, %arg3: memref<16x32xf32, #tpu.memory_space<vmem>>, %arg4: memref<1x1xf32, #tpu.memory_space<vmem>>, %arg5: memref<1x1xf32, #tpu.memory_space<vmem>>) attributes {dimension_semantics = [#tpu.dimension_semantics<parallel>, #tpu.dimension_semantics<arbitrary>], iteration_bounds = array<i64: 1, 1>, scalar_prefetch = 0 : i64, scratch_operands = 1 : i64, tpu.core_type = #tpu.core_type<tc>, window_params = [{transform_indices = @transform_0, window_bounds = array<i64: 16, 32>}, {transform_indices = @transform_1, window_bounds = array<i64: 16, 32>}, {transform_indices = @transform_2, window_bounds = array<i64: 1, 1>}]} {
    %c0_i32 = arith.constant 0 : i32
    %0 = arith.cmpi eq, %arg1, %c0_i32 : i32
    %1 = arith.extui %0 : i1 to i32
    %c0_i32_0 = arith.constant 0 : i32
    %2 = arith.cmpi ne, %1, %c0_i32_0 : i32
    scf.if %2 {
      %cst_17 = arith.constant 0.000000e+00 : f32
      %38 = vector.broadcast %cst_17 : f32 to vector<1x1xf32>
      %c0_18 = arith.constant 0 : index
      %c0_19 = arith.constant 0 : index
      %39 = vector.load %arg5[%c0_18, %c0_19] : memref<1x1xf32, #tpu.memory_space<vmem>>, vector<1x1xf32>
      tpu.vector_store %arg5[%c0_18, %c0_19], %38 {strides = array<i32>} : memref<1x1xf32, #tpu.memory_space<vmem>>, vector<1x1xf32>,
    } else {
    }
    %c0 = arith.constant 0 : index
    %c0_1 = arith.constant 0 : index
    %3 = vector.load %arg2[%c0, %c0_1] : memref<16x32xf32, #tpu.memory_space<vmem>>, vector<16x32xf32>
    %c0_2 = arith.constant 0 : index
    %c0_3 = arith.constant 0 : index
    %4 = vector.load %arg3[%c0_2, %c0_3] : memref<16x32xf32, #tpu.memory_space<vmem>>, vector<16x32xf32>
    %5 = arith.mulf %3, %3 : vector<16x32xf32>
    %cst = arith.constant dense<0.000000e+00> : vector<16xf32>
    %6 = vector.multi_reduction <add>, %5, %cst [1] : vector<16x32xf32> to vector<16xf32>
    %7 = vector.shape_cast %6 : vector<16xf32> to vector<16x1xf32>
    %8 = arith.mulf %4, %4 : vector<16x32xf32>
    %cst_4 = arith.constant dense<0.000000e+00> : vector<16xf32>
    %9 = vector.multi_reduction <add>, %8, %cst_4 [1] : vector<16x32xf32> to vector<16xf32>
    %10 = vector.shape_cast %9 : vector<16xf32> to vector<16x1xf32>
    %11 = arith.mulf %3, %4 : vector<16x32xf32>
    %cst_5 = arith.constant dense<0.000000e+00> : vector<16xf32>
    %12 = vector.multi_reduction <add>, %11, %cst_5 [1] : vector<16x32xf32> to vector<16xf32>
    %13 = vector.shape_cast %12 : vector<16xf32> to vector<16x1xf32>
    %14 = math.sqrt %7 : vector<16x1xf32>
    %cst_6 = arith.constant 9.99999996E-13 : f32
    %15 = vector.broadcast %cst_6 : f32 to vector<16x1xf32>
    %16 = arith.maximumf %14, %15 : vector<16x1xf32>
    %17 = math.sqrt %10 : vector<16x1xf32>
    %cst_7 = arith.constant 9.99999996E-13 : f32
    %18 = vector.broadcast %cst_7 : f32 to vector<16x1xf32>
    %19 = arith.maximumf %17, %18 : vector<16x1xf32>
    %20 = arith.mulf %16, %19 : vector<16x1xf32>
    %21 = tpu.reciprocal %20 {approx = true} : vector<16x1xf32> -> vector<16x1xf32>
    %22 = arith.mulf %13, %21 : vector<16x1xf32>
    %cst_8 = arith.constant 2.000000e+00 : f32
    %23 = vector.broadcast %cst_8 : f32 to vector<16x1xf32>
    %24 = arith.mulf %23, %22 : vector<16x1xf32>
    %cst_9 = arith.constant 2.000000e+00 : f32
    %25 = vector.broadcast %cst_9 : f32 to vector<16x1xf32>
    %26 = arith.subf %25, %24 : vector<16x1xf32>
    %c0_10 = arith.constant 0 : index
    %c0_11 = arith.constant 0 : index
    %27 = vector.load %arg5[%c0_10, %c0_11] : memref<1x1xf32, #tpu.memory_space<vmem>>, vector<1x1xf32>
    %28 = vector.shape_cast %26 : vector<16x1xf32> to vector<1x16x1xf32>
    %cst_12 = arith.constant dense<0.000000e+00> : vector<1xf32>
    %29 = vector.multi_reduction <add>, %28, %cst_12 [1, 2] : vector<1x16x1xf32> to vector<1xf32>
    %30 = vector.shape_cast %29 : vector<1xf32> to vector<1x1x1xf32>
    %31 = vector.extract %30[0, 0, 0] : f32 from vector<1x1x1xf32>
    %32 = vector.broadcast %31 : f32 to vector<1x1xf32>
    %33 = arith.addf %27, %32 : vector<1x1xf32>
    %c0_13 = arith.constant 0 : index
    %c0_14 = arith.constant 0 : index
    %34 = vector.load %arg5[%c0_13, %c0_14] : memref<1x1xf32, #tpu.memory_space<vmem>>, vector<1x1xf32>
    tpu.vector_store %arg5[%c0_13, %c0_14], %33 {strides = array<i32>} : memref<1x1xf32, #tpu.memory_space<vmem>>, vector<1x1xf32>,
    %c0_i32_15 = arith.constant 0 : i32
    %35 = arith.cmpi eq, %arg1, %c0_i32_15 : i32
    %36 = arith.extui %35 : i1 to i32
    %c0_i32_16 = arith.constant 0 : i32
    %37 = arith.cmpi ne, %36, %c0_i32_16 : i32
    scf.if %37 {
      %c0_17 = arith.constant 0 : index
      %c0_18 = arith.constant 0 : index
      %38 = vector.load %arg5[%c0_17, %c0_18] : memref<1x1xf32, #tpu.memory_space<vmem>>, vector<1x1xf32>
      %c0_19 = arith.constant 0 : index
      %c0_20 = arith.constant 0 : index
      %39 = vector.load %arg4[%c0_19, %c0_20] : memref<1x1xf32, #tpu.memory_space<vmem>>, vector<1x1xf32>
      tpu.vector_store %arg4[%c0_19, %c0_20], %38 {strides = array<i32>} : memref<1x1xf32, #tpu.memory_space<vmem>>, vector<1x1xf32>,
    } else {
    }
    return
  }
  func.func @transform_0(%arg0: i32, %arg1: i32) -> (i32, i32) {
    %c1_i32 = arith.constant 1 : i32
    %0 = arith.muli %arg0, %c1_i32 : i32
    %1 = arith.addi %0, %arg1 : i32
    %c0_i32 = arith.constant 0 : i32
    %c0_i32_0 = arith.constant 0 : i32
    return %1, %c0_i32 : i32, i32
  }
  func.func @transform_1(%arg0: i32, %arg1: i32) -> (i32, i32) {
    %c1_i32 = arith.constant 1 : i32
    %0 = arith.muli %arg0, %c1_i32 : i32
    %1 = arith.addi %0, %arg1 : i32
    %c0_i32 = arith.constant 0 : i32
    %c0_i32_0 = arith.constant 0 : i32
    return %1, %c0_i32 : i32, i32
  }
  func.func @transform_2(%arg0: i32, %arg1: i32) -> (i32, i32) {
    %c0_i32 = arith.constant 0 : i32
    %c0_i32_0 = arith.constant 0 : i32
    return %arg0, %c0_i32 : i32, i32
  }
}

</mosaic_0001>

<bundles_post_ra>
// kernel: tpu_custom_call.1
= control target key start
LH: loop header
LB: loop body
LE: loop exit
PB: predicated region body
PF: predicated region fallthrough
CT: control target
= control target key end

     0   :  { %7 = vsyncpa [#allocation4], 0  ;;  %s331_s0 = inlined_call_operand.hbm [shape: f32[16,32], index: 0, kind: input, shape index: {}]   ;;  %s332_s1 = inlined_call_operand.hbm [shape: f32[16,32], index: 1, kind: input, shape index: {}]   ;;  %s333_s2 = inlined_call_operand.hbm [shape: f32[1,1], index: 2, kind: output, shape index: {}]  }
   0x1   :  { %8 = vsyncpa [#allocation7], 0 }
   0x2   :  { %9 = vsyncpa [#allocation5], 0  ;;  %s18_s11 = sshll.u32 %s331_s0, 4  ;;  %s292_s12 = smov [#allocation3]   ;;  %s19_s11 = int_to_ptr.hbm [resolvable:$true] %s18_s11 }
   0x3   :  { %s20_s13 = sshll.u32 %s292_s12, 4  ;;  %s35_s16 = sshll.u32 %s332_s1, 4  ;;  %s21_s13 = int_to_ptr.vmem [resolvable:$true] %s20_s13  ;;  %s36_s16 = int_to_ptr.hbm [resolvable:$true] %s35_s16 }
   0x4   :  { %s293_s17 = smov 128   ;;  %s294_s18 = smov 8  }
   0x5   :  { %26 = dma.hbm_to_vmem [thread:$0]  %s19_s11, 256, %s21_s13, [#allocation4], %s293_s17, %s293_s17, %s294_s18  }
   0x6   :  { %s295_s19 = smov [#allocation6]  }
   0x7   :  { %s37_s20 = sshll.u32 %s295_s19, 4  ;;  %s38_s20 = int_to_ptr.vmem [resolvable:$true] %s37_s20 }
   0x8   :  { %43 = dma.hbm_to_vmem [thread:$0]  %s36_s16, 256, %s38_s20, [#allocation7], %s293_s17, %s293_s17, %s294_s18  }
   0x9   :  { %286 = dma.done.wait [#allocation4], 256  }
   0xa   :  { %287 = vsyncadd [#allocation4], 4294967040 }
   0xb   :  { %288 = dma.done.wait [#allocation7], 256  }
   0xc   :  { %289 = vsyncadd [#allocation7], 4294967040  ;;  %v64_v0 = vld [vmem:[#allocation6] sm:$0xff]  ;;  %vm68_vm0 = vcmask 261120   ;;  %v62_v1 = vld [vmem:[#allocation3] sm:$0xff]  ;;  %vm154_vm9 = vcmask 7168  }
   0xd   :  { %v75_v2 = vmul.f32 %v64_v0, %v64_v0  ;;  %v66_v3 = vmul.f32 %v62_v1, %v62_v1  ;;  %v83_v4 = vmul.f32 %v64_v0, %v62_v1  ;;  %v65_v5 = vld [vmem:[#allocation6 + $0x8] sm:$0xff]  ;;  %v63_v6 = vld [vmem:[#allocation3 + $0x8] sm:$0xff]  ;;  %vm60_vm10 = vcmask 0   ;;  %s297_s1 = smov [#allocation8]   ;;  %s183_s24 = sshll.u32 %s333_s2, 4  ;;  %s184_s24 = int_to_ptr.hbm [resolvable:$true] %s183_s24 }
   0xe   :  { %v76_v10 = vmul.f32 %v65_v5, %v65_v5  ;;  %v67_v11 = vmul.f32 %v63_v6, %v63_v6  ;;  %v84_v12 = vmul.f32 %v65_v5, %v63_v6  ;;  %s181_s21 = sshll.u32 %s297_s1, 4  ;;  %s182_s21 = int_to_ptr.vmem [resolvable:$true] %s181_s21 }
   0xf   :  { %v77_v7 = vsel %vm68_vm0, %v75_v2, 0.0  ;;  %v69_v8 = vsel %vm68_vm0, %v66_v3, 0.0  ;;  %v85_v9 = vsel %vm68_vm0, %v83_v4, 0.0 }
  0x10   :  { %78 = vadd.xlane.f32.xlu1 %v77_v7  ;;  %70 = vadd.xlane.f32.xlu0 %v69_v8  ;;  %v80_v13 = vsel %vm68_vm0, %v76_v10, 0.0  ;;  %v72_v14 = vsel %vm68_vm0, %v67_v11, 0.0  ;;  %v88_v15 = vsel %vm68_vm0, %v84_v12, 0.0 }
  0x11   :  { %86 = vadd.xlane.f32.xlu2 %v85_v9 }
  0x18   :  { %81 = vadd.xlane.f32.xlu1 %v80_v13  ;;  %73 = vadd.xlane.f32.xlu0 %v72_v14 }
  0x19   :  { %89 = vadd.xlane.f32.xlu2 %v88_v15  ;;  %v296_v15 = vmov 0.0  }
  0x1a   :  { %61 = vst.msk [vmem:[#allocation2] sm:$0x1] %vm60_vm10, %v296_v15 }
  0x83   :  { %v79_v16 = vpop.xlane.xlu1 %78  ;;  %v71_v17 = vpop.xlane.xlu0 %70 }
  0x84   :  { %202 = vrsqrt.f32 %v79_v16  ;;  %vm124_vm1 = vcmp.eq.f32.partialorder %v79_v16, inf  ;;  %vm126_vm2 = vcmp.eq.f32.partialorder %v79_v16, 0.0  ;;  %v127_v40 = vand.u32 2147483648, %v79_v16  ;;  %v87_v60 = vpop.xlane.xlu2 %86 }
  0x85   :  { %204 = vrsqrt.f32 %v71_v17  ;;  %vm98_vm3 = vcmp.eq.f32.partialorder %v71_v17, inf  ;;  %v101_v43 = vand.u32 2147483648, %v71_v17  ;;  %vm100_vm4 = vcmp.eq.f32.partialorder %v71_v17, 0.0 }
  0x8a   :  { %v203_v18 = vpop.eup %202 }
  0x8b   :  { %v205_v19 = vpop.eup %204  ;;  %v118_v20 = vmul.f32 %v203_v18, %v79_v16  ;;  %v82_v21 = vpop.xlane.xlu1 %81 }
  0x8c   :  { %v74_v22 = vpop.xlane.xlu0 %73  ;;  %v92_v23 = vmul.f32 %v205_v19, %v71_v17  ;;  %206 = vrsqrt.f32 %v82_v21  ;;  %vm136_vm5 = vcmp.eq.f32.partialorder %v82_v21, inf  ;;  %v139_v56 = vand.u32 2147483648, %v82_v21  ;;  %v90_v5 = vpop.xlane.xlu2 %89 }
  0x8d   :  { %v119_v24 = vmul.f32 %v203_v18, %v118_v20  ;;  %208 = vrsqrt.f32 %v74_v22  ;;  %vm138_vm6 = vcmp.eq.f32.partialorder %v82_v21, 0.0  ;;  %vm110_vm7 = vcmp.eq.f32.partialorder %v74_v22, inf }
  0x8e   :  { %v93_v25 = vmul.f32 %v205_v19, %v92_v23  ;;  %v113_v59 = vand.u32 2147483648, %v74_v22  ;;  %vm112_vm8 = vcmp.eq.f32.partialorder %v74_v22, 0.0  ;;  %v153_v23 = vld [vmem:[#allocation2] sm:$0x1] }
  0x8f   :  { %v120_v26 = vmul.f32 0.5, %v119_v24 }
  0x90   :  { %v94_v27 = vmul.f32 0.5, %v93_v25 }
  0x91   :  { %v121_v28 = vsub.f32 1.5, %v120_v26 }
  0x92   :  { %v207_v29 = vpop.eup %206  ;;  %v95_v30 = vsub.f32 1.5, %v94_v27 }
  0x93   :  { %v209_v31 = vpop.eup %208  ;;  %v122_v32 = vmul.f32 %v203_v18, %v121_v28  ;;  %v130_v33 = vmul.f32 %v207_v29, %v82_v21 }
  0x94   :  { %v96_v34 = vmul.f32 %v205_v19, %v95_v30  ;;  %v104_v35 = vmul.f32 %v209_v31, %v74_v22 }
  0x95   :  { %v123_v36 = vmul.f32 %v122_v32, %v79_v16  ;;  %v131_v37 = vmul.f32 %v207_v29, %v130_v33 }
  0x96   :  { %v97_v38 = vmul.f32 %v96_v34, %v71_v17  ;;  %v105_v39 = vmul.f32 %v209_v31, %v104_v35 }
  0x97   :  { %v132_v41 = vmul.f32 0.5, %v131_v37  ;;  %v125_v42 = vsel %vm124_vm1, %v79_v16, %v123_v36 }
  0x98   :  { %v106_v44 = vmul.f32 0.5, %v105_v39  ;;  %v128_v45 = vsel %vm126_vm2, %v127_v40, %v125_v42  ;;  %v99_v46 = vsel %vm98_vm3, %v71_v17, %v97_v38 }
  0x99   :  { %v133_v47 = vsub.f32 1.5, %v132_v41  ;;  %v141_v48 = vmax.f32 %v128_v45, 1e-12  ;;  %v102_v49 = vsel %vm100_vm4, %v101_v43, %v99_v46 }
  0x9a   :  { %v107_v50 = vsub.f32 1.5, %v106_v44  ;;  %v115_v51 = vmax.f32 %v102_v49, 1e-12 }
  0x9b   :  { %v134_v52 = vmul.f32 %v207_v29, %v133_v47 }
  0x9c   :  { %v108_v53 = vmul.f32 %v209_v31, %v107_v50  ;;  %v143_v54 = vmul.f32 %v141_v48, %v115_v51 }
  0x9d   :  { %v135_v55 = vmul.f32 %v134_v52, %v82_v21 }
  0x9e   :  { %v109_v57 = vmul.f32 %v108_v53, %v74_v22  ;;  %210 = vrcp.f32 %v143_v54 }
  0x9f   :  { %v137_v58 = vsel %vm136_vm5, %v82_v21, %v135_v55 }
  0xa0   :  { %v140_v61 = vsel %vm138_vm6, %v139_v56, %v137_v58  ;;  %v111_v62 = vsel %vm110_vm7, %v74_v22, %v109_v57 }
  0xa1   :  { %v142_v63 = vmax.f32 %v140_v61, 1e-12  ;;  %v114_v0 = vsel %vm112_vm8, %v113_v59, %v111_v62 }
  0xa2   :  { %v116_v1 = vmax.f32 %v114_v0, 1e-12 }
  0xa4   :  { %v211_v2 = vpop.eup %210  ;;  %v144_v3 = vmul.f32 %v142_v63, %v116_v1 }
  0xa5   :  { %v147_v4 = vmul.f32 %v211_v2, %v87_v60 }
  0xa6   :  { %212 = vrcp.f32 %v144_v3 }
  0xa7   :  { %v149_v6 = vmul.f32 2.0, %v147_v4 }
  0xa9   :  { %v151_v9 = vsub.f32 2.0, %v149_v6 }
  0xab   :  { %v155_v12 = vsel %vm154_vm9, %v151_v9, 0.0 }
  0xac   :  { %v213_v7 = vpop.eup %212 }
  0xad   :  { %v148_v8 = vmul.f32 %v213_v7, %v90_v5 }
  0xaf   :  { %v150_v10 = vmul.f32 2.0, %v148_v8 }
  0xb1   :  { %v152_v11 = vsub.f32 2.0, %v150_v10 }
  0xb3   :  { %v156_v13 = vsel %vm154_vm9, %v152_v11, 0.0 }
  0xb4   :  { %v157_v14 = vadd.f32 %v156_v13, %v155_v12 }
  0xb6   :  { %158 = vadd.xlane.f32.xlu0 %v157_v14 }
 0x129   :  { %v159_v16 = vpop.xlane.xlu0 %158 }
 0x12a   :  { %v160_v17 = vrot.slane %v159_v16, 4 }
 0x12c   :  { %v161_v18 = vadd.f32 %v160_v17, %v159_v16 }
 0x12e   :  { %v162_v19 = vrot.slane %v161_v18, 2 }
 0x130   :  { %v163_v20 = vadd.f32 %v162_v19, %v161_v18 }
 0x132   :  { %v164_v21 = vrot.slane %v163_v20, 1 }
 0x134   :  { %v165_v22 = vadd.f32 %v164_v21, %v163_v20 }
 0x136   :  { %194 = vpush %v165_v22 }
 0x167   :  { %s195_s0 = spop %194 }
 0x168   :  { %v167_v24 = vstv %s195_s0 }
 0x169   :  { %v168_v25 = vadd.f32 %v167_v24, %v153_v23 }
 0x16b   :  { %170 = vst.msk [vmem:[#allocation2] sm:$0x1] %vm60_vm10, %v168_v25 }
 0x172   :  { %v174_v26 = vld [vmem:[#allocation2] sm:$0x1] }
 0x173   :  { %175 = vst.msk [vmem:[#allocation8] sm:$0x1] %vm60_vm10, %v174_v26 }
 0x174   :  { %186 = dma.vmem_to_hbm [thread:$0]  %s182_s21, 16, %s184_s24, [#allocation5]  }
 0x175   :  { %290 = dma.done.wait [#allocation5], 16  }
 0x176   :  { %291 = vsyncadd [#allocation5], 4294967280 }
 0x177   :  { %191 = vsyncpa [#allocation4], 1 }
 0x178   :  { %192 = vsyncpa [#allocation7], 1 }
 0x179   :  { %193 = vsyncpa [#allocation5], 1 }

</bundles_post_ra>
